<compile_context>
chip_gen: v7x
topology: tpu7x:2x2x1
jax: 0.10.0
libtpu: 0.0.40
codegen_flags: <defaults>
</compile_context>

<pallas_src>
import jax
import jax.numpy as jnp
from jax.experimental import pallas as pl
from jax.experimental.pallas import tpu as pltpu


def _dpa_kernel(h_ref, enc_ref, o_ref):
    # h_ref:   (TB, H)    hidden vectors for this batch tile
    # enc_ref: (TB, S, H) encoder states for this batch tile
    # o_ref:   (TB, H)    attention-weighted sum over S
    h = h_ref[...]                                              # native dtype

    # scores_bs = <enc_bs, h_b>: multiply in the input dtype, accumulate the
    # lane (H) reduction in f32.  Keep S on sublanes: scores are (TB, S, 1).
    scores = jnp.sum(enc_ref[...] * h[:, None, :], axis=-1,
                     keepdims=True, dtype=jnp.float32)          # (TB, S, 1)

    # max-stabilized softmax over the source axis S (axis=1, sublanes)
    m = jnp.max(scores, axis=1, keepdims=True)                  # (TB, 1, 1)
    e = jnp.exp(scores - m)                                     # (TB, S, 1)
    denom = jnp.sum(e, axis=1, keepdims=True)                   # (TB, 1, 1)
    w = e * pl.reciprocal(denom, approx=False)                  # (TB, S, 1)

    # out_b = sum_s w_bs * enc_bs: multiply in input dtype, accumulate f32.
    w_in = w.astype(enc_ref.dtype)                              # (TB, S, 1)
    out = jnp.sum(w_in * enc_ref[...], axis=1, dtype=jnp.float32)  # (TB, H)
    o_ref[...] = out.astype(o_ref.dtype)


def _vmem_capacity_bytes():
    """Physical per-core VMEM; conservative 64 MiB fallback (v7x)."""
    try:
        info = pltpu.get_tpu_info()
        cap = int(getattr(info, "vmem_capacity_bytes", 0) or 0)
        if cap > 0:
            return cap
    except Exception:
        pass
    return 64 * 1024 * 1024


def _pick_block_b(B, S, H, itemsize, vmem_limit_bytes, buf_target_bytes):
    """Choose the batch-tile size TB."""
    row_bytes = max(S * H * itemsize, 1)
    # Hard cap: double-buffered native-dtype slab + an f32-sized working set
    # (scores/weights and any compiler-materialized product) must fit.
    per_row_live = 2 * row_bytes + 2 * S * H * 4
    hard_cap = max(1, (vmem_limit_bytes - (2 << 20)) // per_row_live)
    tb = min(max(1, buf_target_bytes // row_bytes), hard_cap)
    if tb >= B:
        # Whole batch fits in one slab.  If B is big enough to keep blocks
        # sublane-aligned, split into >=2 blocks so both TensorCores on v7x
        # get work from the "parallel" grid axis.
        if B >= 16:
            return ((-(-B // 2) + 7) // 8) * 8
        return B
    # Keep (TB, H) blocks sublane-aligned (multiple of 8) when TB < B.
    # TODO(synk): if even an 8-row slab exceeds VMEM (very large S*H), an
    # S-tiled online-softmax variant (extra "arbitrary" grid axis) is needed.
    return max(8, (tb // 8) * 8)


def dot_product_attention(hidden_state, encoder_states, *, block_b=None):
    """hidden_state: (1, B, H); encoder_states: (B, S, H) -> (B, 1, H)."""
    _, B, H = hidden_state.shape
    Bk, S, Hk = encoder_states.shape
    assert B == Bk and H == Hk

    out_dtype = encoder_states.dtype
    itemsize = jnp.dtype(encoder_states.dtype).itemsize

    # Generation-aware VMEM budget (48 MiB scoped on 64 MiB parts, 96 MiB on
    # 128 MiB parts) and ~limit/12 encoder bytes per pipeline buffer.
    vmem_cap = _vmem_capacity_bytes()
    vmem_limit = max(32 << 20, min((vmem_cap * 3) // 4, vmem_cap - (16 << 20)))
    buf_target = vmem_limit // 12

    if block_b is not None:
        tb = min(int(block_b), B)
    else:
        tb = _pick_block_b(B, S, H, itemsize, vmem_limit, buf_target)
    n_blocks = pl.cdiv(B, tb)

    # (1, B, H) -> (B, H): pure metadata reshape, no HBM copy.
    h2d = jnp.reshape(hidden_state, (B, H))

    # TODO(synk): for H not a multiple of 128 (e.g. the demo H=32) vector ops
    # run at H/128 lane occupancy; folding batch rows into lanes (or padding H
    # once at model-setup time) would restore full-lane, unmasked stores.
    out2d = pl.pallas_call(
        _dpa_kernel,
        out_shape=jax.ShapeDtypeStruct((B, H), out_dtype),
        grid_spec=pltpu.PrefetchScalarGridSpec(
            num_scalar_prefetch=0,
            grid=(n_blocks,),
            in_specs=[
                pl.BlockSpec((tb, H), lambda b: (b, 0)),
                pl.BlockSpec((tb, S, H), lambda b: (b, 0, 0)),
            ],
            out_specs=pl.BlockSpec((tb, H), lambda b: (b, 0)),
        ),
        compiler_params=pltpu.CompilerParams(
            dimension_semantics=("parallel",),
            vmem_limit_bytes=vmem_limit),
    )(h2d, encoder_states)

    return jnp.reshape(out2d, (B, 1, H))


def _reference(hidden_state, encoder_states):
    # pure-JAX reference mirroring the PyTorch forward exactly
    h_t = jnp.squeeze(hidden_state, axis=0)                     # (B, H)
    h_t = h_t[:, :, None]                                       # (B, H, 1)
    score = jnp.einsum("bsh,bho->bso", encoder_states, h_t)     # (B, S, 1)
    attention_weights = jnp.squeeze(score, axis=2)              # (B, S)
    normalized = jax.nn.softmax(attention_weights, axis=1)[..., None]
    attention_output = normalized * encoder_states              # (B, S, H)
    return jnp.sum(attention_output, axis=1, keepdims=True)     # (B, 1, H)


if __name__ == "__main__":
    B, S, H = 2, 8, 32   # batch, source seq len, hidden dim (== encoder dim)

    key = jax.random.PRNGKey(0)
    k1, k2 = jax.random.split(key)
    hidden_state = jax.random.normal(k1, (1, B, H), dtype=jnp.float32)
    encoder_states = jax.random.normal(k2, (B, S, H), dtype=jnp.float32)

    out = dot_product_attention(hidden_state, encoder_states)
    out = jax.block_until_ready(out)

    ref = _reference(hidden_state, encoder_states)
    assert out.shape == (B, 1, H)
    max_err = jnp.max(jnp.abs(out - ref))
    assert jnp.allclose(out, ref, atol=1e-4, rtol=1e-4), f"max abs err {max_err}"

    print("KERNEL_OK")
</pallas_src>

<mosaic_0001>
module attributes {stable_mosaic.version = 11 : i64} {
  func.func @_dpa_kernel(%arg0: i32, %arg1: memref<2x32xf32, #tpu.memory_space<vmem>>, %arg2: memref<2x8x32xf32, #tpu.memory_space<vmem>>, %arg3: memref<2x32xf32, #tpu.memory_space<vmem>>) attributes {dimension_semantics = [#tpu.dimension_semantics<parallel>], iteration_bounds = array<i64: 1>, scalar_prefetch = 0 : i64, scratch_operands = 0 : i64, tpu.core_type = #tpu.core_type<tc>, window_params = [{transform_indices = @transform_0, window_bounds = array<i64: 2, 32>}, {transform_indices = @transform_1, window_bounds = array<i64: 2, 8, 32>}, {transform_indices = @transform_2, window_bounds = array<i64: 2, 32>}]} {
    %c0 = arith.constant 0 : index
    %c0_0 = arith.constant 0 : index
    %0 = vector.load %arg1[%c0, %c0_0] : memref<2x32xf32, #tpu.memory_space<vmem>>, vector<2x32xf32>
    %c0_1 = arith.constant 0 : index
    %c0_2 = arith.constant 0 : index
    %c0_3 = arith.constant 0 : index
    %1 = vector.load %arg2[%c0_1, %c0_2, %c0_3] : memref<2x8x32xf32, #tpu.memory_space<vmem>>, vector<2x8x32xf32>
    %2 = vector.shape_cast %0 : vector<2x32xf32> to vector<2x1x32xf32>
    %3 = vector.broadcast %2 : vector<2x1x32xf32> to vector<2x8x32xf32>
    %4 = arith.mulf %1, %3 : vector<2x8x32xf32>
    %cst = arith.constant dense<0.000000e+00> : vector<2x8xf32>
    %5 = vector.multi_reduction <add>, %4, %cst [2] : vector<2x8x32xf32> to vector<2x8xf32>
    %6 = vector.shape_cast %5 : vector<2x8xf32> to vector<2x8x1xf32>
    %cst_4 = arith.constant dense<0xFF800000> : vector<2x1xf32>
    %7 = vector.multi_reduction <maximumf>, %6, %cst_4 [1] : vector<2x8x1xf32> to vector<2x1xf32>
    %8 = vector.shape_cast %7 : vector<2x1xf32> to vector<2x1x1xf32>
    %9 = vector.broadcast %8 : vector<2x1x1xf32> to vector<2x8x1xf32>
    %10 = arith.subf %6, %9 : vector<2x8x1xf32>
    %11 = math.exp %10 : vector<2x8x1xf32>
    %cst_5 = arith.constant dense<0.000000e+00> : vector<2x1xf32>
    %12 = vector.multi_reduction <add>, %11, %cst_5 [1] : vector<2x8x1xf32> to vector<2x1xf32>
    %13 = vector.shape_cast %12 : vector<2x1xf32> to vector<2x1x1xf32>
    %14 = tpu.reciprocal %13 : vector<2x1x1xf32> -> vector<2x1x1xf32>
    %15 = vector.broadcast %14 : vector<2x1x1xf32> to vector<2x8x1xf32>
    %16 = arith.mulf %11, %15 : vector<2x8x1xf32>
    %c0_6 = arith.constant 0 : index
    %c0_7 = arith.constant 0 : index
    %c0_8 = arith.constant 0 : index
    %17 = vector.load %arg2[%c0_6, %c0_7, %c0_8] : memref<2x8x32xf32, #tpu.memory_space<vmem>>, vector<2x8x32xf32>
    %18 = vector.broadcast %16 : vector<2x8x1xf32> to vector<2x8x32xf32>
    %19 = arith.mulf %18, %17 : vector<2x8x32xf32>
    %cst_9 = arith.constant dense<0.000000e+00> : vector<2x32xf32>
    %20 = vector.multi_reduction <add>, %19, %cst_9 [1] : vector<2x8x32xf32> to vector<2x32xf32>
    %c0_10 = arith.constant 0 : index
    %c0_11 = arith.constant 0 : index
    %21 = vector.load %arg3[%c0_10, %c0_11] : memref<2x32xf32, #tpu.memory_space<vmem>>, vector<2x32xf32>
    tpu.vector_store %arg3[%c0_10, %c0_11], %20 {strides = array<i32>} : memref<2x32xf32, #tpu.memory_space<vmem>>, vector<2x32xf32>,
    return
  }
  func.func @transform_0(%arg0: i32) -> (i32, i32) {
    %c0_i32 = arith.constant 0 : i32
    %c0_i32_0 = arith.constant 0 : i32
    return %arg0, %c0_i32 : i32, i32
  }
  func.func @transform_1(%arg0: i32) -> (i32, i32, i32) {
    %c0_i32 = arith.constant 0 : i32
    %c0_i32_0 = arith.constant 0 : i32
    %c0_i32_1 = arith.constant 0 : i32
    return %arg0, %c0_i32, %c0_i32_0 : i32, i32, i32
  }
  func.func @transform_2(%arg0: i32) -> (i32, i32) {
    %c0_i32 = arith.constant 0 : i32
    %c0_i32_0 = arith.constant 0 : i32
    return %arg0, %c0_i32 : i32, i32
  }
}

</mosaic_0001>

<bundles_post_ra>
// kernel: tpu_custom_call.1
= control target key start
LH: loop header
LB: loop body
LE: loop exit
PB: predicated region body
PF: predicated region fallthrough
CT: control target
= control target key end

     0   :  { %7 = vsyncpa [#allocation3], 0  ;;  %s311_s0 = inlined_call_operand.hbm [shape: f32[2,32], index: 0, kind: input, shape index: {}]   ;;  %s312_s1 = inlined_call_operand.hbm [shape: f32[2,8,32], index: 1, kind: input, shape index: {}]   ;;  %s313_s2 = inlined_call_operand.hbm [shape: f32[2,32], index: 2, kind: output, shape index: {}]  }
   0x1   :  { %8 = vsyncpa [#allocation6], 0 }
   0x2   :  { %9 = vsyncpa [#allocation4], 0  ;;  %s243_s9 = smov [#allocation2]   ;;  %s244_s11 = smov [#allocation5]  }
   0x3   :  { %s16_s10 = sshll.u32 %s243_s9, 4  ;;  %s25_s12 = sshll.u32 %s244_s11, 4  ;;  %s17_s10 = int_to_ptr.vmem [resolvable:$true] %s16_s10  ;;  %s264_s12 = int_to_ptr.vmem [resolvable:$true] %s25_s12 }
   0x4   :  { %s171_s15 = scalar_lea.hbm %s311_s0, 32 }
   0x5   :  { %p172_p0 = scmp.ne.s32.totalorder %s311_s0, %s171_s15  ;;  %p175_p1 = scmp.lt.u32.totalorder %s171_s15, %s311_s0 }
   0x7   :  { %p177_p2 = pnand %p175_p1, %p172_p0 }
   0x9   :  { %180 = shalt.err (!%p177_p2)
}
   0xa   :  { %s181_s20 = scalar_lea.vmem %s17_s10, 32  ;;  %p186_p4 = scmp.lt.s32.totalorder %s17_s10, %s17_s10 }
   0xb   :  { %p182_p3 = scmp.ne.s32.totalorder %s17_s10, %s181_s20  ;;  %p187_p5 = scmp.lt.s32.totalorder %s181_s20, %s181_s20 }
   0xd   :  { %p188_p6 = por %p187_p5, %p186_p4 }
   0xf   :  { %p189_p7 = pnand %p188_p6, %p182_p3 }
  0x11   :  { %192 = shalt.err (!%p189_p7)
}
  0x12   :  { %19 = dma.hbm_to_vmem [thread:$0]  %s311_s0, 32, %s17_s10, [#allocation3]  }
  0x13   :  { %s193_s25 = scalar_lea.hbm %s312_s1, 256 }
  0x14   :  { %p194_p8 = scmp.ne.s32.totalorder %s312_s1, %s193_s25  ;;  %p197_p9 = scmp.lt.u32.totalorder %s193_s25, %s312_s1 }
  0x16   :  { %p199_p10 = pnand %p197_p9, %p194_p8 }
  0x18   :  { %202 = shalt.err (!%p199_p10)
}
  0x19   :  { %s203_s30 = scalar_lea.vmem %s264_s12, 256  ;;  %p208_p12 = scmp.lt.s32.totalorder %s264_s12, %s264_s12 }
  0x1a   :  { %p204_p11 = scmp.ne.s32.totalorder %s264_s12, %s203_s30  ;;  %p209_p13 = scmp.lt.s32.totalorder %s203_s30, %s203_s30 }
  0x1c   :  { %p210_p0 = por %p209_p13, %p208_p12 }
  0x1e   :  { %p211_p1 = pnand %p210_p0, %p204_p11 }
  0x20   :  { %214 = shalt.err (!%p211_p1)
}
  0x21   :  { %s245_s0 = smov 128   ;;  %s246_s3 = smov 8  }
  0x22   :  { %31 = dma.hbm_to_vmem [thread:$0]  %s312_s1, 256, %s264_s12, [#allocation6], %s245_s0, %s245_s0, %s246_s3  }
  0x23   :  { %237 = dma.done.wait [#allocation3], 32  }
  0x24   :  { %238 = vsyncadd [#allocation3], 4294967264 }
  0x25   :  { %239 = dma.done.wait [#allocation6], 256  }
  0x26   :  { %240 = vsyncadd [#allocation6], 4294967040  ;;  %v53_v0 = vlaneseq  ;;  %v247_v1 = vmov 1966171168   ;;  %v39_v10 = vld [vmem:[#allocation5] sm:$0xff]  ;;  %vm76_vm0 = vcmask 261120  }
  0x27   :  { %v51_v2 = vunpack.c.l.s4 %v247_v1  ;;  %v156_v7 = vld.sshfl [vmem:[#allocation2] sm:$0x11 pattern:$0x75316420]  ;;  %v40_v13 = vld [vmem:[#allocation5 + $0x8] sm:$0xff]  ;;  %s248_s1 = smov [#allocation7]  }
  0x28   :  { %v54_v3 = vshrl.u32 %v53_v0, 7  ;;  %v49_v9 = vcombine.high %v156_v7, %v156_v7  ;;  %s146_s6 = sshll.u32 %s248_s1, 4  ;;  %vm135_vm1 = vcmask 1041409   ;;  %vm138_vm2 = vcmask 254976   ;;  %s147_s6 = int_to_ptr.vmem [resolvable:$true] %s146_s6 }
  0x29   :  { %v52_v4 = vunpack.c.0.s8 %v51_v2  ;;  %s215_s7 = scalar_lea.vmem %s147_s6, 32  ;;  %p220_p3 = scmp.lt.s32.totalorder %s147_s6, %s147_s6 }
  0x2a   :  { %v66_v6 = vsub.s32 0, %v54_v3  ;;  %p216_p2 = scmp.ne.s32.totalorder %s147_s6, %s215_s7  ;;  %p221_p4 = scmp.lt.s32.totalorder %s215_s7, %s215_s7 }
  0x2b   :  { %v55_v5 = vsub.s32 %v52_v4, %v54_v3 }
  0x2c   :  { %p222_p5 = por %p221_p4, %p220_p3 }
  0x2d   :  { %v56_v8 = vrot.slane %v156_v7, %v55_v5  ;;  %v63_v12 = vrot.slane %v49_v9, %v55_v5 }
  0x2e   :  { %p223_p6 = pnand %p222_p5, %p216_p2 }
  0x2f   :  { %v67_v11 = vrot.slane %v56_v8, %v66_v6  ;;  %v71_v15 = vrot.slane %v63_v12, %v66_v6 }
  0x31   :  { %v74_v14 = vmul.f32 %v67_v11, %v39_v10  ;;  %v75_v17 = vmul.f32 %v71_v15, %v40_v13 }
  0x33   :  { %v77_v16 = vsel %vm76_vm0, %v74_v14, 0.0  ;;  %v80_v18 = vsel %vm76_vm0, %v75_v17, 0.0 }
  0x34   :  { %78 = vadd.xlane.f32.xlu0 %v77_v16 }
  0x38   :  { %81 = vadd.xlane.f32.xlu0 %v80_v18 }
  0xc1   :  { %v79_v19 = vpop.xlane.xlu0 %78 }
  0xc2   :  { %v83_v20 = vrot.slane %v79_v19, 4 }
  0xc4   :  { %v84_v21 = vmax.f32 %v79_v19, %v83_v20 }
  0xc5   :  { %v82_v22 = vpop.xlane.xlu0 %81 }
  0xc6   :  { %v85_v23 = vrot.slane %v84_v21, 2  ;;  %v89_v24 = vrot.slane %v82_v22, 4 }
  0xc8   :  { %v86_v25 = vmax.f32 %v84_v21, %v85_v23  ;;  %v90_v26 = vmax.f32 %v82_v22, %v89_v24 }
  0xca   :  { %v87_v27 = vrot.slane %v86_v25, 1  ;;  %v91_v28 = vrot.slane %v90_v26, 2 }
  0xcc   :  { %v88_v29 = vmax.f32 %v86_v25, %v87_v27  ;;  %v92_v30 = vmax.f32 %v90_v26, %v91_v28 }
  0xce   :  { %v95_v31 = vsub.f32 %v79_v19, %v88_v29  ;;  %v93_v32 = vrot.slane %v92_v30, 1 }
  0xd0   :  { %v97_v33 = vmul.f32 1.442695, %v95_v31  ;;  %v94_v34 = vmax.f32 %v92_v30, %v93_v32 }
  0xd2   :  { %163 = vpow2.f32 %v97_v33  ;;  %v96_v35 = vsub.f32 %v82_v22, %v94_v34 }
  0xd4   :  { %v99_v36 = vmul.f32 1.442695, %v96_v35 }
  0xd6   :  { %165 = vpow2.f32 %v99_v36 }
  0xdc   :  { %v164_v37 = vpop.eup %163 }
  0xdd   :  { %v101_v38 = vrot.slane %v164_v37, 4 }
  0xdf   :  { %v102_v39 = vadd.f32 %v164_v37, %v101_v38 }
  0xe0   :  { %v166_v40 = vpop.eup %165 }
  0xe1   :  { %v103_v41 = vrot.slane %v102_v39, 2  ;;  %v107_v42 = vrot.slane %v166_v40, 4 }
  0xe3   :  { %v108_v43 = vadd.f32 %v166_v40, %v107_v42  ;;  %v104_v44 = vadd.f32 %v103_v41, %v102_v39 }
  0xe5   :  { %v109_v45 = vrot.slane %v108_v43, 2  ;;  %v105_v46 = vrot.slane %v104_v44, 1 }
  0xe7   :  { %v110_v47 = vadd.f32 %v109_v45, %v108_v43  ;;  %v106_v48 = vadd.f32 %v105_v46, %v104_v44 }
  0xe9   :  { %v111_v49 = vrot.slane %v110_v47, 1  ;;  %167 = vrcp.f32 %v106_v48 }
  0xeb   :  { %v112_v50 = vadd.f32 %v111_v49, %v110_v47 }
  0xed   :  { %169 = vrcp.f32 %v112_v50 }
  0xf3   :  { %v168_v51 = vpop.eup %167 }
  0xf4   :  { %v115_v52 = vmul.f32 %v168_v51, %v164_v37 }
  0xf6   :  { %v117_v53 = vmul.f32 %v115_v52, %v39_v10 }
  0xf7   :  { %v170_v54 = vpop.eup %169 }
  0xf8   :  { %v116_v55 = vmul.f32 %v170_v54, %v166_v40  ;;  %v119_v56 = vsel %vm76_vm0, %v117_v53, 0.0 }
  0xf9   :  { %v120_v57 = vrot.slane %v119_v56, 4 }
  0xfa   :  { %v118_v58 = vmul.f32 %v116_v55, %v40_v13 }
  0xfb   :  { %v121_v59 = vadd.f32 %v120_v57, %v119_v56 }
  0xfc   :  { %v126_v60 = vsel %vm76_vm0, %v118_v58, 0.0 }
  0xfd   :  { %v122_v61 = vrot.slane %v121_v59, 2  ;;  %v127_v62 = vrot.slane %v126_v60, 4 }
  0xff   :  { %v123_v63 = vadd.f32 %v122_v61, %v121_v59  ;;  %v128_v0 = vadd.f32 %v127_v62, %v126_v60 }
 0x101   :  { %v129_v1 = vrot.slane %v128_v0, 2  ;;  %v124_v2 = vrot.slane %v123_v63, 1 }
 0x103   :  { %v130_v3 = vadd.f32 %v129_v1, %v128_v0  ;;  %v125_v5 = vadd.f32 %v124_v2, %v123_v63 }
 0x105   :  { %v131_v4 = vrot.slane %v130_v3, 1 }
 0x107   :  { %v132_v6 = vadd.f32 %v131_v4, %v130_v3 }
 0x109   :  { %v136_v7 = vsel %vm135_vm1, %v132_v6, %v125_v5 }
 0x10a   :  { %139 = vst.msk [vmem:[#allocation7] sm:$0x3] %vm138_vm2, %v136_v7 }
 0x10b   :  { %226 = shalt.err (!%p223_p6)
}
 0x10c   :  { %s227_s10 = scalar_lea.hbm %s313_s2, 32 }
 0x10d   :  { %p228_p7 = scmp.ne.s32.totalorder %s313_s2, %s227_s10  ;;  %p231_p8 = scmp.lt.u32.totalorder %s227_s10, %s313_s2 }
 0x10f   :  { %p233_p9 = pnand %p231_p8, %p228_p7 }
 0x111   :  { %236 = shalt.err (!%p233_p9)
}
 0x112   :  { %149 = dma.vmem_to_hbm [thread:$0]  %s147_s6, 32, %s313_s2, [#allocation4]  }
 0x113   :  { %241 = dma.done.wait [#allocation4], 32  }
 0x114   :  { %242 = vsyncadd [#allocation4], 4294967264 }
 0x115   :  { %153 = vsyncpa [#allocation3], 1 }
 0x116   :  { %154 = vsyncpa [#allocation6], 1 }
 0x117   :  { %155 = vsyncpa [#allocation4], 1 }

</bundles_post_ra>
